<compile_context>
chip_gen: v7x
topology: tpu7x:2x2x1
jax: 0.10.0
libtpu: 0.0.40
codegen_flags: <defaults>
</compile_context>

<pallas_src>
import jax
import jax.numpy as jnp
from jax.experimental import pallas as pl
from jax.experimental.pallas import tpu as pltpu

_K = 784          # 28*28 flattened image
_H1 = 512
_H2 = 256
_MAX_TILE_B = 1024  # ~15 MiB VMEM at f32 x + f32 intermediates -> v7x-safe


def _discriminator_kernel(x_ref, w1_ref, b1_ref, w2_ref, b2_ref, w3_ref, b3_ref,
                          o_ref):
    # x : (tile_b, 784) f32      w1: (784, 512) bf16   b1: (1, 512) f32
    # w2: (512, 256) bf16        b2: (1, 256) f32
    # w3: (1, 256) f32 (row)     b3: (1, 1) f32 in SMEM
    # Cast raw f32 images to bf16 on the VPU (x streams from HBM exactly once).
    x = x_ref[...].astype(jnp.bfloat16)

    # Layer 1: Linear + LeakyReLU(0.2)  (bf16 MXU inputs, f32 accumulation)
    h1 = jnp.dot(x, w1_ref[...], preferred_element_type=jnp.float32) + b1_ref[...]
    h1 = jnp.maximum(h1, 0.2 * h1)

    # Layer 2: Linear + LeakyReLU(0.2)
    h2 = jnp.dot(h1.astype(jnp.bfloat16), w2_ref[...],
                 preferred_element_type=jnp.float32) + b2_ref[...]
    h2 = jnp.maximum(h2, 0.2 * h2)

    # Layer 3 (256 -> 1): VPU multiply + lane (XLU) reduction; scalar SMEM bias.
    h3 = jnp.sum(h2 * w3_ref[...], axis=-1, keepdims=True) + b3_ref[0, 0]

    # Sigmoid in f32 on the EUP.
    o_ref[...] = jax.nn.sigmoid(h3)


def _round_up(n, m):
    return ((n + m - 1) // m) * m


@jax.jit
def discriminator_forward(img, params):
    """img: (B, 1, 28, 28) float32 (NCHW, like PyTorch). Returns (B, 1) f32."""
    w1, b1, w2, b2, w3, b3 = params
    B = img.shape[0]

    # Same flattening as img.view(B, -1); contiguous reshape is metadata-only.
    x = img.reshape(B, -1)
    if x.dtype != jnp.float32:
        x = x.astype(jnp.float32)

    # Batch tile: multiple of 16 (bf16 sublane packing); >= 2 grid steps for
    # B >= 32 so the parallel batch axis shards across both v7x TensorCores.
    tile_b = min(_MAX_TILE_B, _round_up((B + 1) // 2, 16))
    b_pad = _round_up(B, tile_b)
    if b_pad != B:  # only copies x when B isn't already tile-aligned
        x = jnp.pad(x, ((0, b_pad - B), (0, 0)))

    # Weights: MXU operands in bf16; biases and the (elementwise) layer-3
    # weight row in f32; layer-3 bias as an SMEM scalar.
    w1b = w1.astype(jnp.bfloat16)
    w2b = w2.astype(jnp.bfloat16)
    w3row = w3.reshape(1, _H2).astype(jnp.float32)
    b1f = b1.reshape(1, _H1).astype(jnp.float32)
    b2f = b2.reshape(1, _H2).astype(jnp.float32)
    b3s = b3.reshape(1, 1).astype(jnp.float32)

    grid = (b_pad // tile_b,)

    flops = 2 * b_pad * (_K * _H1 + _H1 * _H2 + _H2)
    bytes_accessed = (b_pad * _K * 4                      # raw f32 x read
                      + w1b.size * 2 + w2b.size * 2       # bf16 weights
                      + (b1f.size + b2f.size + w3row.size + b3s.size) * 4
                      + b_pad * 4)                        # f32 output
    cost = pl.CostEstimate(flops=flops, transcendentals=2 * b_pad,
                           bytes_accessed=bytes_accessed)

    out = pl.pallas_call(
        _discriminator_kernel,
        out_shape=jax.ShapeDtypeStruct((b_pad, 1), jnp.float32),
        grid=grid,
        in_specs=[
            pl.BlockSpec((tile_b, _K), lambda i: (i, 0)),     # x tile (streamed)
            pl.BlockSpec((_K, _H1), lambda i: (0, 0)),        # w1 resident
            pl.BlockSpec((1, _H1), lambda i: (0, 0)),         # b1 resident
            pl.BlockSpec((_H1, _H2), lambda i: (0, 0)),       # w2 resident
            pl.BlockSpec((1, _H2), lambda i: (0, 0)),         # b2 resident
            pl.BlockSpec((1, _H2), lambda i: (0, 0)),         # w3 row resident
            pl.BlockSpec((1, 1), lambda i: (0, 0),            # b3 scalar
                         memory_space=pltpu.MemorySpace.SMEM),
        ],
        out_specs=pl.BlockSpec((tile_b, 1), lambda i: (i, 0)),
        compiler_params=pltpu.CompilerParams(
            dimension_semantics=("parallel",),
            vmem_limit_bytes=32 * 1024 * 1024,
        ),
        cost_estimate=cost,
    )(x, w1b, b1f, w2b, b2f, w3row, b3s)

    return out[:B]


def init_params(key):
    """Deterministic synthetic parameters (PyTorch Linear init, transposed)."""
    ks = jax.random.split(key, 6)

    def linear(kw, kb, fan_in, fan_out):
        bound = 1.0 / jnp.sqrt(jnp.float32(fan_in))
        w = jax.random.uniform(kw, (fan_in, fan_out), jnp.float32, -bound, bound)
        b = jax.random.uniform(kb, (1, fan_out), jnp.float32, -bound, bound)
        return w, b

    w1, b1 = linear(ks[0], ks[1], _K, _H1)
    w2, b2 = linear(ks[2], ks[3], _H1, _H2)
    w3, b3 = linear(ks[4], ks[5], _H2, 1)
    return (w1, b1, w2, b2, w3, b3)


def _reference_forward(img, params):
    """Pure-JAX f32 reference replicating the PyTorch forward."""
    w1, b1, w2, b2, w3, b3 = params
    x = img.reshape(img.shape[0], -1)
    h = x @ w1 + b1
    h = jnp.where(h > 0, h, 0.2 * h)
    h = h @ w2 + b2
    h = jnp.where(h > 0, h, 0.2 * h)
    h = h @ w3 + b3
    return jax.nn.sigmoid(h)


if __name__ == "__main__":
    key = jax.random.PRNGKey(0)
    k_param, k_img = jax.random.split(key)

    params = init_params(k_param)
    img = jax.random.normal(k_img, (2, 1, 28, 28), dtype=jnp.float32)

    out = discriminator_forward(img, params)
    out = jax.block_until_ready(out)

    ref = _reference_forward(img, params)
    assert out.shape == (2, 1), out.shape
    # bf16 MXU inputs with f32 accumulation: relax tolerance vs the f32 reference.
    assert jnp.allclose(out, ref, atol=2e-2, rtol=2e-2), (out, ref)
    assert bool(jnp.all((out >= 0.0) & (out <= 1.0)))

    print("KERNEL_OK")
</pallas_src>

<mosaic_0001>
module attributes {stable_mosaic.version = 11 : i64} {
  func.func @_discriminator_kernel(%arg0: i32, %arg1: memref<16x784xf32, #tpu.memory_space<vmem>>, %arg2: memref<784x512xbf16, #tpu.memory_space<vmem>>, %arg3: memref<1x512xf32, #tpu.memory_space<vmem>>, %arg4: memref<512x256xbf16, #tpu.memory_space<vmem>>, %arg5: memref<1x256xf32, #tpu.memory_space<vmem>>, %arg6: memref<1x256xf32, #tpu.memory_space<vmem>>, %arg7: memref<1x1xf32, #tpu.memory_space<smem>>, %arg8: memref<16x1xf32, #tpu.memory_space<vmem>>) attributes {dimension_semantics = [#tpu.dimension_semantics<parallel>], iteration_bounds = array<i64: 1>, scalar_prefetch = 0 : i64, scratch_operands = 0 : i64, tpu.core_type = #tpu.core_type<tc>, window_params = [{transform_indices = @transform_0, window_bounds = array<i64: 16, 784>}, {pipeline_mode = #tpu.pipeline_mode<synchronous>, transform_indices = @transform_1, window_bounds = array<i64: 784, 512>}, {pipeline_mode = #tpu.pipeline_mode<synchronous>, transform_indices = @transform_2, window_bounds = array<i64: 1, 512>}, {pipeline_mode = #tpu.pipeline_mode<synchronous>, transform_indices = @transform_3, window_bounds = array<i64: 512, 256>}, {pipeline_mode = #tpu.pipeline_mode<synchronous>, transform_indices = @transform_4, window_bounds = array<i64: 1, 256>}, {pipeline_mode = #tpu.pipeline_mode<synchronous>, transform_indices = @transform_5, window_bounds = array<i64: 1, 256>}, {transform_indices = @transform_6, window_bounds = array<i64: 1, 1>}, {transform_indices = @transform_7, window_bounds = array<i64: 16, 1>}]} {
    %c0 = arith.constant 0 : index
    %c0_0 = arith.constant 0 : index
    %0 = vector.load %arg1[%c0, %c0_0] : memref<16x784xf32, #tpu.memory_space<vmem>>, vector<16x784xf32>
    %1 = arith.truncf %0 : vector<16x784xf32> to vector<16x784xbf16>
    %c0_1 = arith.constant 0 : index
    %c0_2 = arith.constant 0 : index
    %2 = vector.load %arg2[%c0_1, %c0_2] : memref<784x512xbf16, #tpu.memory_space<vmem>>, vector<784x512xbf16>
    %cst = arith.constant dense<0.000000e+00> : vector<16x512xf32>
    %3 = tpu.matmul %1, %2, %cst {dimension_numbers = #tpu.dot_dimension_numbers<[1], [0], [0], [1], [0, 0, 1, 1], [], []>} : vector<16x784xbf16>, vector<784x512xbf16>, vector<16x512xf32> -> vector<16x512xf32>
    %c0_3 = arith.constant 0 : index
    %c0_4 = arith.constant 0 : index
    %4 = vector.load %arg3[%c0_3, %c0_4] : memref<1x512xf32, #tpu.memory_space<vmem>>, vector<1x512xf32>
    %5 = vector.broadcast %4 : vector<1x512xf32> to vector<16x512xf32>
    %6 = arith.addf %3, %5 : vector<16x512xf32>
    %cst_5 = arith.constant 2.000000e-01 : f32
    %7 = vector.broadcast %cst_5 : f32 to vector<16x512xf32>
    %8 = arith.mulf %7, %6 : vector<16x512xf32>
    %9 = arith.maximumf %6, %8 : vector<16x512xf32>
    %10 = arith.truncf %9 : vector<16x512xf32> to vector<16x512xbf16>
    %c0_6 = arith.constant 0 : index
    %c0_7 = arith.constant 0 : index
    %11 = vector.load %arg4[%c0_6, %c0_7] : memref<512x256xbf16, #tpu.memory_space<vmem>>, vector<512x256xbf16>
    %cst_8 = arith.constant dense<0.000000e+00> : vector<16x256xf32>
    %12 = tpu.matmul %10, %11, %cst_8 {dimension_numbers = #tpu.dot_dimension_numbers<[1], [0], [0], [1], [0, 0, 1, 1], [], []>} : vector<16x512xbf16>, vector<512x256xbf16>, vector<16x256xf32> -> vector<16x256xf32>
    %c0_9 = arith.constant 0 : index
    %c0_10 = arith.constant 0 : index
    %13 = vector.load %arg5[%c0_9, %c0_10] : memref<1x256xf32, #tpu.memory_space<vmem>>, vector<1x256xf32>
    %14 = vector.broadcast %13 : vector<1x256xf32> to vector<16x256xf32>
    %15 = arith.addf %12, %14 : vector<16x256xf32>
    %cst_11 = arith.constant 2.000000e-01 : f32
    %16 = vector.broadcast %cst_11 : f32 to vector<16x256xf32>
    %17 = arith.mulf %16, %15 : vector<16x256xf32>
    %18 = arith.maximumf %15, %17 : vector<16x256xf32>
    %c0_12 = arith.constant 0 : index
    %c0_13 = arith.constant 0 : index
    %19 = vector.load %arg6[%c0_12, %c0_13] : memref<1x256xf32, #tpu.memory_space<vmem>>, vector<1x256xf32>
    %20 = vector.broadcast %19 : vector<1x256xf32> to vector<16x256xf32>
    %21 = arith.mulf %18, %20 : vector<16x256xf32>
    %cst_14 = arith.constant dense<0.000000e+00> : vector<16xf32>
    %22 = vector.multi_reduction <add>, %21, %cst_14 [1] : vector<16x256xf32> to vector<16xf32>
    %23 = vector.shape_cast %22 : vector<16xf32> to vector<16x1xf32>
    %c0_15 = arith.constant 0 : index
    %c0_16 = arith.constant 0 : index
    %24 = memref.load %arg7[%c0_15, %c0_16] : memref<1x1xf32, #tpu.memory_space<smem>>
    %25 = vector.broadcast %24 : f32 to vector<16x1xf32>
    %26 = arith.addf %23, %25 : vector<16x1xf32>
    %27 = arith.negf %26 : vector<16x1xf32>
    %28 = math.exp %27 : vector<16x1xf32>
    %cst_17 = arith.constant 1.000000e+00 : f32
    %29 = vector.broadcast %cst_17 : f32 to vector<16x1xf32>
    %30 = arith.addf %29, %28 : vector<16x1xf32>
    %31 = arith.divf %29, %30 : vector<16x1xf32>
    %c0_18 = arith.constant 0 : index
    %c0_19 = arith.constant 0 : index
    %32 = vector.load %arg8[%c0_18, %c0_19] : memref<16x1xf32, #tpu.memory_space<vmem>>, vector<16x1xf32>
    tpu.vector_store %arg8[%c0_18, %c0_19], %31 {strides = array<i32>} : memref<16x1xf32, #tpu.memory_space<vmem>>, vector<16x1xf32>,
    return
  }
  func.func @transform_0(%arg0: i32) -> (i32, i32) {
    %c0_i32 = arith.constant 0 : i32
    %c0_i32_0 = arith.constant 0 : i32
    return %arg0, %c0_i32 : i32, i32
  }
  func.func @transform_1(%arg0: i32) -> (i32, i32) {
    %c0_i32 = arith.constant 0 : i32
    %c0_i32_0 = arith.constant 0 : i32
    %c0_i32_1 = arith.constant 0 : i32
    return %c0_i32, %c0_i32_0 : i32, i32
  }
  func.func @transform_2(%arg0: i32) -> (i32, i32) {
    %c0_i32 = arith.constant 0 : i32
    %c0_i32_0 = arith.constant 0 : i32
    %c0_i32_1 = arith.constant 0 : i32
    return %c0_i32, %c0_i32_0 : i32, i32
  }
  func.func @transform_3(%arg0: i32) -> (i32, i32) {
    %c0_i32 = arith.constant 0 : i32
    %c0_i32_0 = arith.constant 0 : i32
    %c0_i32_1 = arith.constant 0 : i32
    return %c0_i32, %c0_i32_0 : i32, i32
  }
  func.func @transform_4(%arg0: i32) -> (i32, i32) {
    %c0_i32 = arith.constant 0 : i32
    %c0_i32_0 = arith.constant 0 : i32
    %c0_i32_1 = arith.constant 0 : i32
    return %c0_i32, %c0_i32_0 : i32, i32
  }
  func.func @transform_5(%arg0: i32) -> (i32, i32) {
    %c0_i32 = arith.constant 0 : i32
    %c0_i32_0 = arith.constant 0 : i32
    %c0_i32_1 = arith.constant 0 : i32
    return %c0_i32, %c0_i32_0 : i32, i32
  }
  func.func @transform_6(%arg0: i32) -> (i32, i32) {
    %c0_i32 = arith.constant 0 : i32
    %c0_i32_0 = arith.constant 0 : i32
    %c0_i32_1 = arith.constant 0 : i32
    return %c0_i32, %c0_i32_0 : i32, i32
  }
  func.func @transform_7(%arg0: i32) -> (i32, i32) {
    %c0_i32 = arith.constant 0 : i32
    %c0_i32_0 = arith.constant 0 : i32
    return %arg0, %c0_i32 : i32, i32
  }
}

</mosaic_0001>

<bundles_post_ra>
// kernel: discriminator_forward.1
= control target key start
LH: loop header
LB: loop body
LE: loop exit
PB: predicated region body
PF: predicated region fallthrough
CT: control target
= control target key end

     0   :  { %vm1247_vm0 = vcmask 130048   ;;  %vm2143_vm1 = vcmask 7168   ;;  %s3788_s1 = inlined_call_operand.vmem [shape: bf16[784,512], index: 1, kind: input, shape index: {}]   ;;  %s3789_s0 = inlined_call_operand.vmem [shape: f32[16,784], index: 0, kind: input, shape index: {}]   ;;  %s3790_s3 = inlined_call_operand.vmem [shape: bf16[512,256], index: 3, kind: input, shape index: {}]   ;;  %s3791_s2 = inlined_call_operand.vmem [shape: f32[1,512], index: 2, kind: input, shape index: {}]   ;;  %s3792_s4 = inlined_call_operand.vmem [shape: f32[1,256], index: 4, kind: input, shape index: {}]   ;;  %s3793_s5 = inlined_call_operand.vmem [shape: f32[1,256], index: 5, kind: input, shape index: {}]   ;;  %s3794_s6 = inlined_call_operand.<no memory space> [shape: f32[1,1], index: 6, kind: input, shape index: {}]   ;;  %s3795_s7 = inlined_call_operand.vmem [shape: f32[16,1], index: 7, kind: output, shape index: {}]  }
   0x1   :  { %v2455_v0 = vld [vmem:[%s3788_s1 + $0x4] ss:$16 sps:$4 sm:$0xff]   ;;  %v2459_v2 = vld [vmem:[%s3788_s1] ss:$16 sps:$4 sm:$0xff]   ;;  %v29_v46 = vld [vmem:[%s3789_s0 + $0x8] sm:$0xff] }
   0x2   :  { %v2457_v1 = vld [vmem:[%s3788_s1 + $0x204] ss:$16 sps:$4 sm:$0xff]   ;;  %1251 = vmatprep.subr.bf16.mxu1 %v2455_v0  ;;  %v2460_v3 = vld [vmem:[%s3788_s1 + $0x200] ss:$16 sps:$4 sm:$0xff]   ;;  %v31_v51 = vld [vmem:[%s3789_s0 + $0x18] sm:$0xff] }
   0x3   :  { %1294 = vmatprep.subr.bf16.mxu0 %v2457_v1  ;;  %v2461_v4 = vld [vmem:[%s3788_s1 + $0x24] ss:$16 sps:$4 sm:$0xff]   ;;  %1252 = vmatpush1.bf16.msra.mxu1 %v2459_v2  ;;  %v2465_v6 = vld [vmem:[%s3788_s1 + $0x20] ss:$16 sps:$4 sm:$0xff]  }
   0x4   :  { %1295 = vmatpush1.bf16.msra.mxu0 %v2460_v3  ;;  %v2463_v5 = vld [vmem:[%s3788_s1 + $0x224] ss:$16 sps:$4 sm:$0xff]   ;;  %1253 = vmatprep.subr.bf16.mxu1 %v2461_v4  ;;  %v2466_v7 = vld [vmem:[%s3788_s1 + $0x220] ss:$16 sps:$4 sm:$0xff]  }
   0x5   :  { %1296 = vmatprep.subr.bf16.mxu0 %v2463_v5  ;;  %v2467_v8 = vld [vmem:[%s3788_s1 + $0x44] ss:$16 sps:$4 sm:$0xff]   ;;  %v2471_v10 = vld [vmem:[%s3788_s1 + $0x40] ss:$16 sps:$4 sm:$0xff]  }
   0x6   :  { %v2469_v9 = vld [vmem:[%s3788_s1 + $0x244] ss:$16 sps:$4 sm:$0xff]   ;;  %v2472_v11 = vld [vmem:[%s3788_s1 + $0x240] ss:$16 sps:$4 sm:$0xff]  }
   0x7   :  { %1254 = vmatpush1.bf16.msra.mxu1 %v2465_v6  ;;  %v2473_v12 = vld [vmem:[%s3788_s1 + $0x64] ss:$16 sps:$4 sm:$0xff]   ;;  %v2477_v14 = vld [vmem:[%s3788_s1 + $0x60] ss:$16 sps:$4 sm:$0xff]  }
   0x8   :  { %1297 = vmatpush1.bf16.msra.mxu0 %v2466_v7  ;;  %1255 = vmatprep.subr.bf16.mxu1 %v2467_v8  ;;  %v2475_v13 = vld [vmem:[%s3788_s1 + $0x264] ss:$16 sps:$4 sm:$0xff]   ;;  %v2478_v15 = vld [vmem:[%s3788_s1 + $0x260] ss:$16 sps:$4 sm:$0xff]   ;;  %v35_v7 = vld [vmem:[%s3789_s0 + $0x38] sm:$0xff] }
   0x9   :  { %1298 = vmatprep.subr.bf16.mxu0 %v2469_v9  ;;  %v2479_v16 = vld [vmem:[%s3788_s1 + $0x84] ss:$16 sps:$4 sm:$0xff]   ;;  %v2483_v18 = vld [vmem:[%s3788_s1 + $0x80] ss:$16 sps:$4 sm:$0xff]  }
   0xa   :  { %v2481_v17 = vld [vmem:[%s3788_s1 + $0x284] ss:$16 sps:$4 sm:$0xff]   ;;  %v2484_v19 = vld [vmem:[%s3788_s1 + $0x280] ss:$16 sps:$4 sm:$0xff]  }
   0xb   :  { %1256 = vmatpush1.bf16.msra.mxu1 %v2471_v10  ;;  %v2485_v20 = vld [vmem:[%s3788_s1 + $0xa4] ss:$16 sps:$4 sm:$0xff]   ;;  %v2489_v22 = vld [vmem:[%s3788_s1 + $0xa0] ss:$16 sps:$4 sm:$0xff]   ;;  %v37_v10 = vld [vmem:[%s3789_s0 + $0x48] sm:$0xff] }
   0xc   :  { %1299 = vmatpush1.bf16.msra.mxu0 %v2472_v11  ;;  %1257 = vmatprep.subr.bf16.mxu1 %v2473_v12  ;;  %v2487_v21 = vld [vmem:[%s3788_s1 + $0x2a4] ss:$16 sps:$4 sm:$0xff]   ;;  %v2490_v23 = vld [vmem:[%s3788_s1 + $0x2a0] ss:$16 sps:$4 sm:$0xff]   ;;  %v2556_v11 = vld [vmem:[%s3788_s1 + $0xc] ss:$16 sps:$4 sm:$0xff]  }
   0xd   :  { %1300 = vmatprep.subr.bf16.mxu0 %v2475_v13  ;;  %v2491_v24 = vld [vmem:[%s3788_s1 + $0xc4] ss:$16 sps:$4 sm:$0xff]   ;;  %v2495_v26 = vld [vmem:[%s3788_s1 + $0xc0] ss:$16 sps:$4 sm:$0xff]  }
   0xe   :  { %v2493_v25 = vld [vmem:[%s3788_s1 + $0x2c4] ss:$16 sps:$4 sm:$0xff]   ;;  %v2496_v27 = vld [vmem:[%s3788_s1 + $0x2c0] ss:$16 sps:$4 sm:$0xff]  }
   0xf   :  { %1258 = vmatpush1.bf16.msra.mxu1 %v2477_v14  ;;  %v2497_v28 = vld [vmem:[%s3788_s1 + $0xe4] ss:$16 sps:$4 sm:$0xff]   ;;  %v2501_v30 = vld [vmem:[%s3788_s1 + $0xe0] ss:$16 sps:$4 sm:$0xff]   ;;  %v2554_v14 = vld [vmem:[%s3788_s1 + $0x8] ss:$16 sps:$4 sm:$0xff]  }
  0x10   :  { %1301 = vmatpush1.bf16.msra.mxu0 %v2478_v15  ;;  %1259 = vmatprep.subr.bf16.mxu1 %v2479_v16  ;;  %v2499_v29 = vld [vmem:[%s3788_s1 + $0x2e4] ss:$16 sps:$4 sm:$0xff]   ;;  %v2502_v31 = vld [vmem:[%s3788_s1 + $0x2e0] ss:$16 sps:$4 sm:$0xff]  }
  0x11   :  { %1302 = vmatprep.subr.bf16.mxu0 %v2481_v17  ;;  %v2503_v32 = vld [vmem:[%s3788_s1 + $0x104] ss:$16 sps:$4 sm:$0xff]   ;;  %v2507_v34 = vld [vmem:[%s3788_s1 + $0x100] ss:$16 sps:$4 sm:$0xff]   ;;  %v2562_v17 = vld [vmem:[%s3788_s1 + $0x2c] ss:$16 sps:$4 sm:$0xff]  }
  0x12   :  { %v2505_v33 = vld [vmem:[%s3788_s1 + $0x304] ss:$16 sps:$4 sm:$0xff]   ;;  %v2508_v35 = vld [vmem:[%s3788_s1 + $0x300] ss:$16 sps:$4 sm:$0xff]  }
  0x13   :  { %1260 = vmatpush1.bf16.msra.mxu1 %v2483_v18  ;;  %v2509_v36 = vld [vmem:[%s3788_s1 + $0x124] ss:$16 sps:$4 sm:$0xff]   ;;  %v2513_v38 = vld [vmem:[%s3788_s1 + $0x120] ss:$16 sps:$4 sm:$0xff]  }
  0x14   :  { %1303 = vmatpush1.bf16.msra.mxu0 %v2484_v19  ;;  %1261 = vmatprep.subr.bf16.mxu1 %v2485_v20  ;;  %v2511_v37 = vld [vmem:[%s3788_s1 + $0x324] ss:$16 sps:$4 sm:$0xff]   ;;  %v2514_v39 = vld [vmem:[%s3788_s1 + $0x320] ss:$16 sps:$4 sm:$0xff]   ;;  %v2560_v19 = vld [vmem:[%s3788_s1 + $0x28] ss:$16 sps:$4 sm:$0xff]  }
  0x15   :  { %1304 = vmatprep.subr.bf16.mxu0 %v2487_v21  ;;  %v2515_v40 = vld [vmem:[%s3788_s1 + $0x144] ss:$16 sps:$4 sm:$0xff]   ;;  %v2519_v42 = vld [vmem:[%s3788_s1 + $0x140] ss:$16 sps:$4 sm:$0xff]   ;;  %v2568_v21 = vld [vmem:[%s3788_s1 + $0x4c] ss:$16 sps:$4 sm:$0xff]  }
  0x16   :  { %v2517_v41 = vld [vmem:[%s3788_s1 + $0x344] ss:$16 sps:$4 sm:$0xff]   ;;  %v2520_v43 = vld [vmem:[%s3788_s1 + $0x340] ss:$16 sps:$4 sm:$0xff]  }
  0x17   :  { %1262 = vmatpush1.bf16.msra.mxu1 %v2489_v22  ;;  %v2521_v44 = vld [vmem:[%s3788_s1 + $0x164] ss:$16 sps:$4 sm:$0xff]   ;;  %v2525_v47 = vld [vmem:[%s3788_s1 + $0x160] ss:$16 sps:$4 sm:$0xff]  }
  0x18   :  { %1305 = vmatpush1.bf16.msra.mxu0 %v2490_v23  ;;  %1263 = vmatprep.subr.bf16.mxu1 %v2491_v24  ;;  %v2523_v45 = vld [vmem:[%s3788_s1 + $0x364] ss:$16 sps:$4 sm:$0xff]   ;;  %v2526_v48 = vld [vmem:[%s3788_s1 + $0x360] ss:$16 sps:$4 sm:$0xff]   ;;  %v2566_v23 = vld [vmem:[%s3788_s1 + $0x48] ss:$16 sps:$4 sm:$0xff]  }
  0x19   :  { %1306 = vmatprep.subr.bf16.mxu0 %v2493_v25  ;;  %v36_v49 = vld [vmem:[%s3789_s0 + $0x40] sm:$0xff]  ;;  %v38_v52 = vld [vmem:[%s3789_s0 + $0x50] sm:$0xff]  ;;  %v2574_v25 = vld [vmem:[%s3788_s1 + $0x6c] ss:$16 sps:$4 sm:$0xff]  }
  0x1a   :  { %v3044_v50 = vpack.c.bf16 %v36_v49, %v29_v46  ;;  %v2527_v53 = vld [vmem:[%s3788_s1 + $0x184] ss:$16 sps:$4 sm:$0xff]   ;;  %v3058_v55 = vpack.c.bf16 %v38_v52, %v31_v51  ;;  %v2531_v56 = vld [vmem:[%s3788_s1 + $0x180] ss:$16 sps:$4 sm:$0xff]   ;;  %v2596_v46 = vld [vmem:[%s3788_s1 + $0xe8] ss:$16 sps:$4 sm:$0xff]  }
  0x1b   :  { %1264 = vmatpush1.bf16.msra.mxu1 %v2495_v26  ;;  %v2529_v54 = vld [vmem:[%s3788_s1 + $0x384] ss:$16 sps:$4 sm:$0xff]   ;;  %v2532_v57 = vld [vmem:[%s3788_s1 + $0x380] ss:$16 sps:$4 sm:$0xff]   ;;  %v2610_v52 = vld [vmem:[%s3788_s1 + $0x12c] ss:$16 sps:$4 sm:$0xff]  }
  0x1c   :  { %1307 = vmatpush1.bf16.msra.mxu0 %v2496_v27  ;;  %1265 = vmatprep.subr.bf16.mxu1 %v2497_v28  ;;  %v2533_v58 = vld [vmem:[%s3788_s1 + $0x1a4] ss:$16 sps:$4 sm:$0xff]   ;;  %v2537_v60 = vld [vmem:[%s3788_s1 + $0x1a0] ss:$16 sps:$4 sm:$0xff]   ;;  %v2572_v27 = vld [vmem:[%s3788_s1 + $0x68] ss:$16 sps:$4 sm:$0xff]  }
  0x1d   :  { %1308 = vmatprep.subr.bf16.mxu0 %v2499_v29  ;;  %1283 = vmatprep.mubr.bf16.mxu1 %v3044_v50  ;;  %v2535_v59 = vld [vmem:[%s3788_s1 + $0x3a4] ss:$16 sps:$4 sm:$0xff]   ;;  %v2538_v61 = vld [vmem:[%s3788_s1 + $0x3a0] ss:$16 sps:$4 sm:$0xff]   ;;  %v2580_v29 = vld [vmem:[%s3788_s1 + $0x8c] ss:$16 sps:$4 sm:$0xff]  }
  0x1e   :  { %1326 = vmatprep.mubr.bf16.mxu0 %v3058_v55  ;;  %v2539_v62 = vld [vmem:[%s3788_s1 + $0x1c4] ss:$16 sps:$4 sm:$0xff]   ;;  %v2543_v0 = vld [vmem:[%s3788_s1 + $0x1c0] ss:$16 sps:$4 sm:$0xff]  }
  0x1f   :  { %1266 = vmatpush1.bf16.msra.mxu1 %v2501_v30  ;;  %v2541_v63 = vld [vmem:[%s3788_s1 + $0x3c4] ss:$16 sps:$4 sm:$0xff]   ;;  %v2544_v1 = vld [vmem:[%s3788_s1 + $0x3c0] ss:$16 sps:$4 sm:$0xff]  }
  0x20   :  { %1309 = vmatpush1.bf16.msra.mxu0 %v2502_v31  ;;  %1267 = vmatprep.subr.bf16.mxu1 %v2503_v32  ;;  %v2545_v2 = vld [vmem:[%s3788_s1 + $0x1e4] ss:$16 sps:$4 sm:$0xff]   ;;  %v2549_v4 = vld [vmem:[%s3788_s1 + $0x1e0] ss:$16 sps:$4 sm:$0xff]   ;;  %v2578_v31 = vld [vmem:[%s3788_s1 + $0x88] ss:$16 sps:$4 sm:$0xff]  }
  0x21   :  { %1310 = vmatprep.subr.bf16.mxu0 %v2505_v33  ;;  %v2547_v3 = vld [vmem:[%s3788_s1 + $0x3e4] ss:$16 sps:$4 sm:$0xff]   ;;  %v2550_v5 = vld [vmem:[%s3788_s1 + $0x3e0] ss:$16 sps:$4 sm:$0xff]   ;;  %v2586_v33 = vld [vmem:[%s3788_s1 + $0xac] ss:$16 sps:$4 sm:$0xff]  }
  0x22   :  { %v28_v6 = vld [vmem:[%s3789_s0] sm:$0xff]  ;;  %v30_v9 = vld [vmem:[%s3789_s0 + $0x10] sm:$0xff] }
  0x23   :  { %1268 = vmatpush1.bf16.msra.mxu1 %v2507_v34  ;;  %v2553_v8 = vld [vmem:[%s3788_s1 + $0x404] ss:$16 sps:$4 sm:$0xff]   ;;  %v3122_v12 = vpack.c.bf16 %v35_v7, %v28_v6  ;;  %v2551_v13 = vld [vmem:[%s3788_s1 + $0x400] ss:$16 sps:$4 sm:$0xff]   ;;  %v3130_v15 = vpack.c.bf16 %v37_v10, %v30_v9  ;;  %v2632_v7 = vld [vmem:[%s3788_s1 + $0x1a8] ss:$16 sps:$4 sm:$0xff]  }
  0x24   :  { %1311 = vmatpush1.bf16.msra.mxu0 %v2508_v35  ;;  %1269 = vmatprep.subr.bf16.mxu1 %v2509_v36  ;;  %v2559_v16 = vld [vmem:[%s3788_s1 + $0x424] ss:$16 sps:$4 sm:$0xff]   ;;  %v2557_v18 = vld [vmem:[%s3788_s1 + $0x420] ss:$16 sps:$4 sm:$0xff]   ;;  %v2584_v35 = vld [vmem:[%s3788_s1 + $0xa8] ss:$16 sps:$4 sm:$0xff]  }
  0x25   :  { %1312 = vmatprep.subr.bf16.mxu0 %v2511_v37  ;;  %v2565_v20 = vld [vmem:[%s3788_s1 + $0x444] ss:$16 sps:$4 sm:$0xff]   ;;  %v2563_v22 = vld [vmem:[%s3788_s1 + $0x440] ss:$16 sps:$4 sm:$0xff]   ;;  %v2592_v37 = vld [vmem:[%s3788_s1 + $0xcc] ss:$16 sps:$4 sm:$0xff]  }
  0x26   :  { %v2571_v24 = vld [vmem:[%s3788_s1 + $0x464] ss:$16 sps:$4 sm:$0xff]   ;;  %v2569_v26 = vld [vmem:[%s3788_s1 + $0x460] ss:$16 sps:$4 sm:$0xff]   ;;  %v2640_v9 = vld [vmem:[%s3788_s1 + $0x1cc] ss:$16 sps:$4 sm:$0xff]  }
  0x27   :  { %1270 = vmatpush1.bf16.msra.mxu1 %v2513_v38  ;;  %v2577_v28 = vld [vmem:[%s3788_s1 + $0x484] ss:$16 sps:$4 sm:$0xff]   ;;  %v2575_v30 = vld [vmem:[%s3788_s1 + $0x480] ss:$16 sps:$4 sm:$0xff]  }
  0x28   :  { %1313 = vmatpush1.bf16.msra.mxu0 %v2514_v39  ;;  %1271 = vmatprep.subr.bf16.mxu1 %v2515_v40  ;;  %v2583_v32 = vld [vmem:[%s3788_s1 + $0x4a4] ss:$16 sps:$4 sm:$0xff]   ;;  %v2581_v34 = vld [vmem:[%s3788_s1 + $0x4a0] ss:$16 sps:$4 sm:$0xff]   ;;  %v2590_v39 = vld [vmem:[%s3788_s1 + $0xc8] ss:$16 sps:$4 sm:$0xff]  }
  0x29   :  { %1314 = vmatprep.subr.bf16.mxu0 %v2517_v41  ;;  %v2589_v36 = vld [vmem:[%s3788_s1 + $0x4c4] ss:$16 sps:$4 sm:$0xff]   ;;  %v2587_v38 = vld [vmem:[%s3788_s1 + $0x4c0] ss:$16 sps:$4 sm:$0xff]   ;;  %v33_v41 = vld [vmem:[%s3789_s0 + $0x28] sm:$0xff] }
  0x2a   :  { %v2595_v40 = vld [vmem:[%s3788_s1 + $0x4e4] ss:$16 sps:$4 sm:$0xff]   ;;  %v2599_v49 = vld [vmem:[%s3788_s1 + $0x500] ss:$16 sps:$4 sm:$0xff]  }
  0x2b   :  { %1272 = vmatpush1.bf16.msra.mxu1 %v2519_v42  ;;  %v40_v42 = vld [vmem:[%s3789_s0 + $0x60] sm:$0xff] }
  0x2c   :  { %1315 = vmatpush1.bf16.msra.mxu0 %v2520_v43  ;;  %1273 = vmatprep.subr.bf16.mxu1 %v2521_v44  ;;  %v2598_v43 = vld [vmem:[%s3788_s1 + $0xec] ss:$16 sps:$4 sm:$0xff]   ;;  %v3219_v44 = vpack.c.bf16 %v40_v42, %v33_v41  ;;  %v2607_v51 = vld [vmem:[%s3788_s1 + $0x524] ss:$16 sps:$4 sm:$0xff]   ;;  %v2629_v6 = vld [vmem:[%s3788_s1 + $0x5a0] ss:$16 sps:$4 sm:$0xff]  }
  0x2d   :  { %1316 = vmatprep.subr.bf16.mxu0 %v2523_v45  ;;  %v2593_v45 = vld [vmem:[%s3788_s1 + $0x4e0] ss:$16 sps:$4 sm:$0xff]   ;;  %v2751_v42 = vld [vmem:[%s3790_s3 + $0x4] ss:$8 sps:$4 sm:$0xff]  }
  0x2e   :  { %v2635_v10 = vld [vmem:[%s3788_s1 + $0x5c0] ss:$16 sps:$4 sm:$0xff]  }
  0x2f   :  { %1274 = vmatpush1.bf16.msra.mxu1 %v2525_v47  ;;  %v2601_v47 = vld [vmem:[%s3788_s1 + $0x504] ss:$16 sps:$4 sm:$0xff]   ;;  %v2749_v41 = vld [vmem:[%s3790_s3] ss:$8 sps:$4 sm:$0xff]  }
  0x30   :  { %1317 = vmatpush1.bf16.msra.mxu0 %v2526_v48  ;;  %1275 = vmatprep.subr.bf16.mxu1 %v2527_v53  ;;  %v2604_v48 = vld [vmem:[%s3788_s1 + $0x10c] ss:$16 sps:$4 sm:$0xff]   ;;  %v2605_v53 = vld [vmem:[%s3788_s1 + $0x520] ss:$16 sps:$4 sm:$0xff]  }
  0x31   :  { %1318 = vmatprep.subr.bf16.mxu0 %v2529_v54  ;;  %v2608_v54 = vld [vmem:[%s3788_s1 + $0x128] ss:$16 sps:$4 sm:$0xff]  }
  0x33   :  { %1276 = vmatpush1.bf16.msra.mxu1 %v2531_v56  ;;  %v2613_v56 = vld [vmem:[%s3788_s1 + $0x544] ss:$16 sps:$4 sm:$0xff]  }
  0x34   :  { %1319 = vmatpush1.bf16.msra.mxu0 %v2532_v57  ;;  %1277 = vmatprep.subr.bf16.mxu1 %v2533_v58  ;;  %v2616_v57 = vld [vmem:[%s3788_s1 + $0x14c] ss:$16 sps:$4 sm:$0xff]   ;;  %v2611_v58 = vld [vmem:[%s3788_s1 + $0x540] ss:$16 sps:$4 sm:$0xff]  }
  0x35   :  { %1320 = vmatprep.subr.bf16.mxu0 %v2535_v59  ;;  %v2614_v59 = vld [vmem:[%s3788_s1 + $0x148] ss:$16 sps:$4 sm:$0xff]  }
  0x37   :  { %1278 = vmatpush1.bf16.msra.mxu1 %v2537_v60  ;;  %v2619_v60 = vld [vmem:[%s3788_s1 + $0x564] ss:$16 sps:$4 sm:$0xff]  }
  0x38   :  { %1321 = vmatpush1.bf16.msra.mxu0 %v2538_v61  ;;  %1279 = vmatprep.subr.bf16.mxu1 %v2539_v62  ;;  %v2622_v61 = vld [vmem:[%s3788_s1 + $0x16c] ss:$16 sps:$4 sm:$0xff]   ;;  %v2617_v62 = vld [vmem:[%s3788_s1 + $0x560] ss:$16 sps:$4 sm:$0xff]  }
  0x39   :  { %1322 = vmatprep.subr.bf16.mxu0 %v2541_v63  ;;  %v2620_v63 = vld [vmem:[%s3788_s1 + $0x168] ss:$16 sps:$4 sm:$0xff]  }
  0x3b   :  { %1280 = vmatpush1.bf16.msra.mxu1 %v2543_v0  ;;  %v2625_v0 = vld [vmem:[%s3788_s1 + $0x584] ss:$16 sps:$4 sm:$0xff]  }
  0x3c   :  { %1323 = vmatpush1.bf16.msra.mxu0 %v2544_v1  ;;  %1281 = vmatprep.subr.bf16.mxu1 %v2545_v2  ;;  %v2628_v1 = vld [vmem:[%s3788_s1 + $0x18c] ss:$16 sps:$4 sm:$0xff]   ;;  %v2623_v2 = vld [vmem:[%s3788_s1 + $0x580] ss:$16 sps:$4 sm:$0xff]  }
  0x3d   :  { %1324 = vmatprep.subr.bf16.mxu0 %v2547_v3  ;;  %v2626_v3 = vld [vmem:[%s3788_s1 + $0x188] ss:$16 sps:$4 sm:$0xff]  }
  0x3f   :  { %1282 = vmatpush1.bf16.msra.mxu1 %v2549_v4  ;;  %v2631_v4 = vld [vmem:[%s3788_s1 + $0x5a4] ss:$16 sps:$4 sm:$0xff]  }
  0x40   :  { %1325 = vmatpush1.bf16.msra.mxu0 %v2550_v5  ;;  %1423 = vmatprep.subr.bf16.mxu1 %v2556_v11  ;;  %v2634_v5 = vld [vmem:[%s3788_s1 + $0x1ac] ss:$16 sps:$4 sm:$0xff]   ;;  %v2638_v11 = vld [vmem:[%s3788_s1 + $0x1c8] ss:$16 sps:$4 sm:$0xff]  }
  0x41   :  { %1337 = vmatprep.subr.bf16.mxu0 %v2553_v8  ;;  %v2637_v8 = vld [vmem:[%s3788_s1 + $0x5c4] ss:$16 sps:$4 sm:$0xff]  }
  0x42   :  { %1284 = vmatmul.mubr.bf16.vlgmr.msra.gmra.mrb[0].mxu1 %v3122_v12 }
  0x43   :  { %1327 = vmatmul.mubr.bf16.vlgmr.msra.gmra.mrb[0].mxu0 %v3130_v15  ;;  %1424 = vmatpush1.bf16.msra.mxu1 %v2554_v14  ;;  %v2646_v14 = vld [vmem:[%s3788_s1 + $0x1ec] ss:$16 sps:$4 sm:$0xff]  }
  0x44   :  { %1338 = vmatpush1.bf16.msra.mxu0 %v2551_v13  ;;  %1425 = vmatprep.subr.bf16.mxu1 %v2562_v17  ;;  %v2643_v13 = vld [vmem:[%s3788_s1 + $0x5e4] ss:$16 sps:$4 sm:$0xff]   ;;  %v2644_v17 = vld [vmem:[%s3788_s1 + $0x1e8] ss:$16 sps:$4 sm:$0xff]  }
  0x45   :  { %1339 = vmatprep.subr.bf16.mxu0 %v2559_v16  ;;  %1455 = vmatprep.mubr.bf16.mxu1 %v3044_v50  ;;  %v2602_v50 = vld [vmem:[%s3788_s1 + $0x108] ss:$16 sps:$4 sm:$0xff]   ;;  %v2641_v16 = vld [vmem:[%s3788_s1 + $0x5e0] ss:$16 sps:$4 sm:$0xff]  }
  0x46   :  { %1369 = vmatprep.mubr.bf16.mxu0 %v3219_v44 }
  0x47   :  { %1426 = vmatpush1.bf16.msra.mxu1 %v2560_v19  ;;  %v39_v19 = vld [vmem:[%s3789_s0 + $0x58] sm:$0xff] }
  0x48   :  { %1340 = vmatpush1.bf16.msra.mxu0 %v2557_v18  ;;  %1427 = vmatprep.subr.bf16.mxu1 %v2568_v21  ;;  %v32_v18 = vld [vmem:[%s3789_s0 + $0x20] sm:$0xff] }
  0x49   :  { %1341 = vmatprep.subr.bf16.mxu0 %v2565_v20  ;;  %v2649_v20 = vld [vmem:[%s3788_s1 + $0x20c] ss:$16 sps:$4 sm:$0xff]   ;;  %v2655_v21 = vld [vmem:[%s3788_s1 + $0x604] ss:$16 sps:$4 sm:$0xff]  }
  0x4b   :  { %1428 = vmatpush1.bf16.msra.mxu1 %v2566_v23  ;;  %v2647_v23 = vld [vmem:[%s3788_s1 + $0x208] ss:$16 sps:$4 sm:$0xff]  }
  0x4c   :  { %1342 = vmatpush1.bf16.msra.mxu0 %v2563_v22  ;;  %1429 = vmatprep.subr.bf16.mxu1 %v2574_v25  ;;  %v3336_v22 = vpack.c.bf16 %v39_v19, %v32_v18  ;;  %v2652_v25 = vld [vmem:[%s3788_s1 + $0x22c] ss:$16 sps:$4 sm:$0xff]   ;;  %v2698_v18 = vld [vmem:[%s3788_s1 + $0x408] ss:$16 sps:$4 sm:$0xff]  }
  0x4d   :  { %1343 = vmatprep.subr.bf16.mxu0 %v2571_v24  ;;  %v2653_v24 = vld [vmem:[%s3788_s1 + $0x600] ss:$16 sps:$4 sm:$0xff]   ;;  %v2703_v19 = vld [vmem:[%s3788_s1 + $0x42c] ss:$16 sps:$4 sm:$0xff]  }
  0x4f   :  { %1430 = vmatpush1.bf16.msra.mxu1 %v2572_v27  ;;  %v2658_v27 = vld [vmem:[%s3788_s1 + $0x24c] ss:$16 sps:$4 sm:$0xff]  }
  0x50   :  { %1344 = vmatpush1.bf16.msra.mxu0 %v2569_v26  ;;  %1431 = vmatprep.subr.bf16.mxu1 %v2580_v29  ;;  %v2650_v26 = vld [vmem:[%s3788_s1 + $0x228] ss:$16 sps:$4 sm:$0xff]   ;;  %v34_v29 = vld [vmem:[%s3789_s0 + $0x30] sm:$0xff] }
  0x51   :  { %1345 = vmatprep.subr.bf16.mxu0 %v2577_v28  ;;  %v2853_v28 = vmov 0  }
  0x53   :  { %1432 = vmatpush1.bf16.msra.mxu1 %v2578_v31  ;;  %v2661_v31 = vld [vmem:[%s3788_s1 + $0x26c] ss:$16 sps:$4 sm:$0xff]  }
  0x54   :  { %1346 = vmatpush1.bf16.msra.mxu0 %v2575_v30  ;;  %1433 = vmatprep.subr.bf16.mxu1 %v2586_v33  ;;  %v41_v30 = vld [vmem:[%s3789_s0 + $0x68] sm:$0xff] }
  0x55   :  { %1347 = vmatprep.subr.bf16.mxu0 %v2583_v32  ;;  %v3369_v32 = vpack.c.bf16 %v41_v30, %v34_v29  ;;  %v2664_v33 = vld [vmem:[%s3788_s1 + $0x28c] ss:$16 sps:$4 sm:$0xff]   ;;  %v2707_v29 = vld [vmem:[%s3788_s1 + $0x468] ss:$16 sps:$4 sm:$0xff]  }
  0x56   :  { %v2712_v30 = vld [vmem:[%s3788_s1 + $0x48c] ss:$16 sps:$4 sm:$0xff]  }
  0x57   :  { %1434 = vmatpush1.bf16.msra.mxu1 %v2584_v35  ;;  %v2667_v35 = vld [vmem:[%s3788_s1 + $0x2ac] ss:$16 sps:$4 sm:$0xff]  }
  0x58   :  { %1348 = vmatpush1.bf16.msra.mxu0 %v2581_v34  ;;  %1435 = vmatprep.subr.bf16.mxu1 %v2592_v37  ;;  %v2662_v34 = vld [vmem:[%s3788_s1 + $0x288] ss:$16 sps:$4 sm:$0xff]   ;;  %v2670_v37 = vld [vmem:[%s3788_s1 + $0x2cc] ss:$16 sps:$4 sm:$0xff]  }
  0x59   :  { %1349 = vmatprep.subr.bf16.mxu0 %v2589_v36  ;;  %v2665_v36 = vld [vmem:[%s3788_s1 + $0x2a8] ss:$16 sps:$4 sm:$0xff]  }
  0x5b   :  { %1436 = vmatpush1.bf16.msra.mxu1 %v2590_v39  ;;  %v2673_v39 = vld [vmem:[%s3788_s1 + $0x2ec] ss:$16 sps:$4 sm:$0xff]  }
  0x5c   :  { %1350 = vmatpush1.bf16.msra.mxu0 %v2587_v38  ;;  %1437 = vmatprep.subr.bf16.mxu1 %v2598_v43  ;;  %v2668_v38 = vld [vmem:[%s3788_s1 + $0x2c8] ss:$16 sps:$4 sm:$0xff]   ;;  %v2676_v43 = vld [vmem:[%s3788_s1 + $0x30c] ss:$16 sps:$4 sm:$0xff]  }
  0x5d   :  { %1351 = vmatprep.subr.bf16.mxu0 %v2595_v40  ;;  %v2671_v40 = vld [vmem:[%s3788_s1 + $0x2e8] ss:$16 sps:$4 sm:$0xff]  }
  0x5f   :  { %1438 = vmatpush1.bf16.msra.mxu1 %v2596_v46  ;;  %v2674_v46 = vld [vmem:[%s3788_s1 + $0x308] ss:$16 sps:$4 sm:$0xff]  }
  0x60   :  { %1352 = vmatpush1.bf16.msra.mxu0 %v2593_v45  ;;  %1439 = vmatprep.subr.bf16.mxu1 %v2604_v48  ;;  %v2754_v45 = vld [vmem:[%s3790_s3 + $0x14] ss:$8 sps:$4 sm:$0xff]   ;;  %v2757_v48 = vld [vmem:[%s3790_s3 + $0x24] ss:$8 sps:$4 sm:$0xff]  }
  0x61   :  { %1353 = vmatprep.subr.bf16.mxu0 %v2601_v47  ;;  %v2752_v47 = vld [vmem:[%s3790_s3 + $0x10] ss:$8 sps:$4 sm:$0xff]  }
  0x63   :  { %1440 = vmatpush1.bf16.msra.mxu1 %v2602_v50  ;;  %v2677_v50 = vld [vmem:[%s3788_s1 + $0x328] ss:$16 sps:$4 sm:$0xff]  }
  0x64   :  { %1354 = vmatpush1.bf16.msra.mxu0 %v2599_v49  ;;  %1441 = vmatprep.subr.bf16.mxu1 %v2610_v52  ;;  %v2679_v49 = vld [vmem:[%s3788_s1 + $0x32c] ss:$16 sps:$4 sm:$0xff]  }
  0x65   :  { %1355 = vmatprep.subr.bf16.mxu0 %v2607_v51  ;;  %v2755_v51 = vld [vmem:[%s3790_s3 + $0x20] ss:$8 sps:$4 sm:$0xff]   ;;  %v2760_v52 = vld [vmem:[%s3790_s3 + $0x34] ss:$8 sps:$4 sm:$0xff]  }
  0x67   :  { %1442 = vmatpush1.bf16.msra.mxu1 %v2608_v54  ;;  %v2680_v54 = vld [vmem:[%s3788_s1 + $0x348] ss:$16 sps:$4 sm:$0xff]  }
  0x68   :  { %1356 = vmatpush1.bf16.msra.mxu0 %v2605_v53  ;;  %1443 = vmatprep.subr.bf16.mxu1 %v2616_v57  ;;  %v2682_v53 = vld [vmem:[%s3788_s1 + $0x34c] ss:$16 sps:$4 sm:$0xff]  }
  0x69   :  { %1357 = vmatprep.subr.bf16.mxu0 %v2613_v56  ;;  %v2758_v56 = vld [vmem:[%s3790_s3 + $0x30] ss:$8 sps:$4 sm:$0xff]   ;;  %v2763_v57 = vld [vmem:[%s3790_s3 + $0x44] ss:$8 sps:$4 sm:$0xff]  }
  0x6b   :  { %1444 = vmatpush1.bf16.msra.mxu1 %v2614_v59  ;;  %v2683_v59 = vld [vmem:[%s3788_s1 + $0x368] ss:$16 sps:$4 sm:$0xff]  }
  0x6c   :  { %1358 = vmatpush1.bf16.msra.mxu0 %v2611_v58  ;;  %1445 = vmatprep.subr.bf16.mxu1 %v2622_v61  ;;  %v2685_v58 = vld [vmem:[%s3788_s1 + $0x36c] ss:$16 sps:$4 sm:$0xff]   ;;  %v2761_v61 = vld [vmem:[%s3790_s3 + $0x40] ss:$8 sps:$4 sm:$0xff]  }
  0x6d   :  { %1359 = vmatprep.subr.bf16.mxu0 %v2619_v60  ;;  %v2688_v60 = vld [vmem:[%s3788_s1 + $0x38c] ss:$16 sps:$4 sm:$0xff]  }
  0x6f   :  { %1446 = vmatpush1.bf16.msra.mxu1 %v2620_v63  ;;  %v2764_v63 = vld [vmem:[%s3790_s3 + $0x50] ss:$8 sps:$4 sm:$0xff]  }
  0x70   :  { %1360 = vmatpush1.bf16.msra.mxu0 %v2617_v62  ;;  %1447 = vmatprep.subr.bf16.mxu1 %v2628_v1  ;;  %v2766_v62 = vld [vmem:[%s3790_s3 + $0x54] ss:$8 sps:$4 sm:$0xff]   ;;  %v2769_v1 = vld [vmem:[%s3790_s3 + $0x64] ss:$8 sps:$4 sm:$0xff]  }
  0x71   :  { %1361 = vmatprep.subr.bf16.mxu0 %v2625_v0  ;;  %v2686_v0 = vld [vmem:[%s3788_s1 + $0x388] ss:$16 sps:$4 sm:$0xff]  }
  0x73   :  { %1448 = vmatpush1.bf16.msra.mxu1 %v2626_v3  ;;  %v2767_v3 = vld [vmem:[%s3790_s3 + $0x60] ss:$8 sps:$4 sm:$0xff]  }
  0x74   :  { %1362 = vmatpush1.bf16.msra.mxu0 %v2623_v2  ;;  %1449 = vmatprep.subr.bf16.mxu1 %v2634_v5  ;;  %v2691_v2 = vld [vmem:[%s3788_s1 + $0x3ac] ss:$16 sps:$4 sm:$0xff]  }
  0x75   :  { %1363 = vmatprep.subr.bf16.mxu0 %v2631_v4  ;;  %v2689_v4 = vld [vmem:[%s3788_s1 + $0x3a8] ss:$16 sps:$4 sm:$0xff]   ;;  %v2772_v5 = vld [vmem:[%s3790_s3 + $0x74] ss:$8 sps:$4 sm:$0xff]  }
  0x77   :  { %1450 = vmatpush1.bf16.msra.mxu1 %v2632_v7  ;;  %v2770_v7 = vld [vmem:[%s3790_s3 + $0x70] ss:$8 sps:$4 sm:$0xff]  }
  0x78   :  { %1364 = vmatpush1.bf16.msra.mxu0 %v2629_v6  ;;  %1451 = vmatprep.subr.bf16.mxu1 %v2640_v9  ;;  %v2694_v6 = vld [vmem:[%s3788_s1 + $0x3cc] ss:$16 sps:$4 sm:$0xff]  }
  0x79   :  { %1365 = vmatprep.subr.bf16.mxu0 %v2637_v8  ;;  %v2692_v8 = vld [vmem:[%s3788_s1 + $0x3c8] ss:$16 sps:$4 sm:$0xff]   ;;  %v2775_v9 = vld [vmem:[%s3790_s3 + $0x84] ss:$8 sps:$4 sm:$0xff]  }
  0x7b   :  { %1452 = vmatpush1.bf16.msra.mxu1 %v2638_v11  ;;  %v2773_v11 = vld [vmem:[%s3790_s3 + $0x80] ss:$8 sps:$4 sm:$0xff]  }
  0x7c   :  { %1366 = vmatpush1.bf16.msra.mxu0 %v2635_v10  ;;  %1453 = vmatprep.subr.bf16.mxu1 %v2646_v14  ;;  %v2697_v10 = vld [vmem:[%s3788_s1 + $0x3ec] ss:$16 sps:$4 sm:$0xff]  }
  0x7d   :  { %1367 = vmatprep.subr.bf16.mxu0 %v2643_v13  ;;  %v2695_v13 = vld [vmem:[%s3788_s1 + $0x3e8] ss:$16 sps:$4 sm:$0xff]   ;;  %v2778_v14 = vld [vmem:[%s3790_s3 + $0x94] ss:$8 sps:$4 sm:$0xff]  }
  0x7f   :  { %1454 = vmatpush1.bf16.msra.mxu1 %v2644_v17  ;;  %v2776_v17 = vld [vmem:[%s3790_s3 + $0x90] ss:$8 sps:$4 sm:$0xff]  }
  0x80   :  { %1368 = vmatpush1.bf16.msra.mxu0 %v2641_v16  ;;  %1466 = vmatprep.subr.bf16.mxu1 %v2649_v20  ;;  %v2700_v16 = vld [vmem:[%s3788_s1 + $0x40c] ss:$16 sps:$4 sm:$0xff]  }
  0x81   :  { %1380 = vmatprep.subr.bf16.mxu0 %v2655_v21  ;;  %v2781_v20 = vld [vmem:[%s3790_s3 + $0xa4] ss:$8 sps:$4 sm:$0xff]   ;;  %v2779_v21 = vld [vmem:[%s3790_s3 + $0xa0] ss:$8 sps:$4 sm:$0xff]  }
  0x82   :  { %1456 = vmatmul.mubr.bf16.vlgmr.msra.gmra.mrb[4].mxu1 %v3122_v12  ;;  %v2656_v12 = vld [vmem:[%s3788_s1 + $0x248] ss:$16 sps:$4 sm:$0xff]  }
  0x83   :  { %1370 = vmatmul.mubr.bf16.vlgmr.msra.gmra.mrb[0].mxu0 %v3336_v22  ;;  %1467 = vmatpush1.bf16.msra.mxu1 %v2647_v23  ;;  %v2701_v23 = vld [vmem:[%s3788_s1 + $0x428] ss:$16 sps:$4 sm:$0xff]  }
  0x84   :  { %1381 = vmatpush1.bf16.msra.mxu0 %v2653_v24  ;;  %1468 = vmatprep.subr.bf16.mxu1 %v2652_v25  ;;  %v2784_v24 = vld [vmem:[%s3790_s3 + $0xb4] ss:$8 sps:$4 sm:$0xff]   ;;  %v2782_v25 = vld [vmem:[%s3790_s3 + $0xb0] ss:$8 sps:$4 sm:$0xff]  }
  0x85   :  { %1412 = vmatprep.mubr.bf16.mxu0 %v2853_v28  ;;  %1498 = vmatprep.mubr.bf16.mxu1 %v3058_v55  ;;  %v2659_v55 = vld [vmem:[%s3788_s1 + $0x268] ss:$16 sps:$4 sm:$0xff]  }
  0x86   :  { %2011 = vmatprep.subr.bf16.mxu0 %v2751_v42  ;;  %v2788_v42 = vld [vmem:[%s3790_s3 + $0xd0] ss:$8 sps:$4 sm:$0xff]  }
  0x87   :  { %1469 = vmatpush1.bf16.msra.mxu1 %v2650_v26  ;;  %v2787_v26 = vld [vmem:[%s3790_s3 + $0xc4] ss:$8 sps:$4 sm:$0xff]  }
  0x88   :  { %1470 = vmatprep.subr.bf16.mxu1 %v2658_v27  ;;  %v2709_v27 = vld [vmem:[%s3788_s1 + $0x46c] ss:$16 sps:$4 sm:$0xff]  }
  0x8b   :  { %1471 = vmatpush1.bf16.msra.mxu1 %v2656_v12  ;;  %v2785_v12 = vld [vmem:[%s3790_s3 + $0xc0] ss:$8 sps:$4 sm:$0xff]  }
  0x8c   :  { %1472 = vmatprep.subr.bf16.mxu1 %v2661_v31  ;;  %v2710_v31 = vld [vmem:[%s3788_s1 + $0x488] ss:$16 sps:$4 sm:$0xff]  }
  0x8f   :  { %2346 = vmatmul.mubr.msk.bf16.vlgmr.msra.gmra.mrb[0].mxu0 %vm1247_vm0, %v3369_v32  ;;  %1473 = vmatpush1.bf16.msra.mxu1 %v2659_v55  ;;  %v2715_v55 = vld [vmem:[%s3788_s1 + $0x4ac] ss:$16 sps:$4 sm:$0xff]  }
  0x90   :  { %1474 = vmatprep.subr.bf16.mxu1 %v2664_v33  ;;  %2012 = vmatpush1.bf16.msra.mxu0 %v2749_v41  ;;  %v2713_v33 = vld [vmem:[%s3788_s1 + $0x4a8] ss:$16 sps:$4 sm:$0xff]   ;;  %v2790_v41 = vld [vmem:[%s3790_s3 + $0xd4] ss:$8 sps:$4 sm:$0xff]  }
  0x91   :  { %2013 = vmatprep.subr.bf16.mxu0 %v2754_v45  ;;  %v2730_v45 = vld [vmem:[%s3788_s1 + $0x54c] ss:$16 sps:$4 sm:$0xff]  }
  0x93   :  { %1475 = vmatpush1.bf16.msra.mxu1 %v2662_v34  ;;  %v2718_v34 = vld [vmem:[%s3788_s1 + $0x4cc] ss:$16 sps:$4 sm:$0xff]  }
  0x94   :  { %1476 = vmatprep.subr.bf16.mxu1 %v2667_v35  ;;  %2014 = vmatpush1.bf16.msra.mxu0 %v2752_v47  ;;  %v2716_v35 = vld [vmem:[%s3788_s1 + $0x4c8] ss:$16 sps:$4 sm:$0xff]  }
  0x95   :  { %2015 = vmatprep.subr.bf16.mxu0 %v2757_v48  ;;  %v2791_v47 = vld [vmem:[%s3790_s3 + $0xe0] ss:$8 sps:$4 sm:$0xff]  }
  0x96   :  { %v2728_v48 = vld [vmem:[%s3788_s1 + $0x548] ss:$16 sps:$4 sm:$0xff]  }
  0x97   :  { %1477 = vmatpush1.bf16.msra.mxu1 %v2665_v36  ;;  %v2721_v36 = vld [vmem:[%s3788_s1 + $0x4ec] ss:$16 sps:$4 sm:$0xff]  }
  0x98   :  { %1478 = vmatprep.subr.bf16.mxu1 %v2670_v37  ;;  %2016 = vmatpush1.bf16.msra.mxu0 %v2755_v51  ;;  %v2719_v37 = vld [vmem:[%s3788_s1 + $0x4e8] ss:$16 sps:$4 sm:$0xff]  }
  0x99   :  { %2017 = vmatprep.subr.bf16.mxu0 %v2760_v52  ;;  %v2794_v51 = vld [vmem:[%s3790_s3 + $0xf0] ss:$8 sps:$4 sm:$0xff]  }
  0x9a   :  { %v2731_v52 = vld [vmem:[%s3788_s1 + $0x568] ss:$16 sps:$4 sm:$0xff]  }
  0x9b   :  { %1479 = vmatpush1.bf16.msra.mxu1 %v2668_v38  ;;  %v2724_v38 = vld [vmem:[%s3788_s1 + $0x50c] ss:$16 sps:$4 sm:$0xff]  }
  0x9c   :  { %1480 = vmatprep.subr.bf16.mxu1 %v2673_v39  ;;  %2018 = vmatpush1.bf16.msra.mxu0 %v2758_v56  ;;  %v2722_v39 = vld [vmem:[%s3788_s1 + $0x508] ss:$16 sps:$4 sm:$0xff]  }
  0x9d   :  { %2019 = vmatprep.subr.bf16.mxu0 %v2763_v57  ;;  %v2734_v56 = vld [vmem:[%s3788_s1 + $0x588] ss:$16 sps:$4 sm:$0xff]   ;;  %v2739_v57 = vld [vmem:[%s3788_s1 + $0x5ac] ss:$16 sps:$4 sm:$0xff]  }
  0x9f   :  { %1481 = vmatpush1.bf16.msra.mxu1 %v2671_v40  ;;  %v2727_v40 = vld [vmem:[%s3788_s1 + $0x52c] ss:$16 sps:$4 sm:$0xff]  }
  0xa0   :  { %1482 = vmatprep.subr.bf16.mxu1 %v2676_v43  ;;  %2020 = vmatpush1.bf16.msra.mxu0 %v2761_v61  ;;  %v2725_v43 = vld [vmem:[%s3788_s1 + $0x528] ss:$16 sps:$4 sm:$0xff]   ;;  %v2745_v61 = vld [vmem:[%s3788_s1 + $0x5ec] ss:$16 sps:$4 sm:$0xff]  }
  0xa1   :  { %2021 = vmatprep.subr.bf16.mxu0 %v2766_v62  ;;  %v2743_v62 = vld [vmem:[%s3788_s1 + $0x5e8] ss:$16 sps:$4 sm:$0xff]  }
  0xa3   :  { %1483 = vmatpush1.bf16.msra.mxu1 %v2674_v46  ;;  %v2793_v46 = vld [vmem:[%s3790_s3 + $0xe4] ss:$8 sps:$4 sm:$0xff]  }
  0xa4   :  { %1484 = vmatprep.subr.bf16.mxu1 %v2679_v49  ;;  %2022 = vmatpush1.bf16.msra.mxu0 %v2764_v63  ;;  %v2733_v49 = vld [vmem:[%s3788_s1 + $0x56c] ss:$16 sps:$4 sm:$0xff]  }
  0xa5   :  { %2023 = vmatprep.subr.bf16.mxu0 %v2769_v1  ;;  %v2748_v63 = vld [vmem:[%s3788_s1 + $0x60c] ss:$16 sps:$4 sm:$0xff]  }
  0xa7   :  { %1485 = vmatpush1.bf16.msra.mxu1 %v2677_v50  ;;  %v2796_v50 = vld [vmem:[%s3790_s3 + $0xf4] ss:$8 sps:$4 sm:$0xff]  }
  0xa8   :  { %1486 = vmatprep.subr.bf16.mxu1 %v2682_v53  ;;  %2024 = vmatpush1.bf16.msra.mxu0 %v2767_v3  ;;  %v2736_v53 = vld [vmem:[%s3788_s1 + $0x58c] ss:$16 sps:$4 sm:$0xff]  }
  0xa9   :  { %2025 = vmatprep.subr.bf16.mxu0 %v2772_v5  ;;  %v247_v5 = vlaneseq }
  0xab   :  { %1487 = vmatpush1.bf16.msra.mxu1 %v2680_v54  ;;  %v2799_v54 = vld [vmem:[%s3790_s3 + $0x104] ss:$8 sps:$4 sm:$0xff]  }
  0xac   :  { %1488 = vmatprep.subr.bf16.mxu1 %v2685_v58  ;;  %2026 = vmatpush1.bf16.msra.mxu0 %v2770_v7  ;;  %v2737_v58 = vld [vmem:[%s3788_s1 + $0x5a8] ss:$16 sps:$4 sm:$0xff]  }
  0xad   :  { %2027 = vmatprep.subr.bf16.mxu0 %v2775_v9 }
  0xaf   :  { %1489 = vmatpush1.bf16.msra.mxu1 %v2683_v59  ;;  %v2742_v59 = vld [vmem:[%s3788_s1 + $0x5cc] ss:$16 sps:$4 sm:$0xff]  }
  0xb0   :  { %1490 = vmatprep.subr.bf16.mxu1 %v2688_v60  ;;  %2028 = vmatpush1.bf16.msra.mxu0 %v2773_v11  ;;  %v2740_v60 = vld [vmem:[%s3788_s1 + $0x5c8] ss:$16 sps:$4 sm:$0xff]  }
  0xb1   :  { %2029 = vmatprep.subr.bf16.mxu0 %v2778_v14 }
  0xb3   :  { %1491 = vmatpush1.bf16.msra.mxu1 %v2686_v0  ;;  %v2746_v0 = vld [vmem:[%s3788_s1 + $0x608] ss:$16 sps:$4 sm:$0xff]  }
  0xb4   :  { %1492 = vmatprep.subr.bf16.mxu1 %v2691_v2  ;;  %2030 = vmatpush1.bf16.msra.mxu0 %v2776_v17 }
  0xb5   :  { %2031 = vmatprep.subr.bf16.mxu0 %v2781_v20 }
  0xb7   :  { %1493 = vmatpush1.bf16.msra.mxu1 %v2689_v4 }
  0xb8   :  { %1494 = vmatprep.subr.bf16.mxu1 %v2694_v6  ;;  %2032 = vmatpush1.bf16.msra.mxu0 %v2779_v21  ;;  %v3655_v6 = vshrl.u32 %v247_v5, 7 }
  0xb9   :  { %2033 = vmatprep.subr.bf16.mxu0 %v2784_v24 }
  0xba   :  { %v3658_v7 = vsub.s32 0, %v3655_v6 }
  0xbb   :  { %1495 = vmatpush1.bf16.msra.mxu1 %v2692_v8 }
  0xbc   :  { %1496 = vmatprep.subr.bf16.mxu1 %v2697_v10  ;;  %2034 = vmatpush1.bf16.msra.mxu0 %v2782_v25 }
  0xbd   :  { %2035 = vmatprep.subr.bf16.mxu0 %v2787_v26 }
  0xbf   :  { %1497 = vmatpush1.bf16.msra.mxu1 %v2695_v13 }
  0xc0   :  { %1509 = vmatprep.subr.bf16.mxu1 %v2700_v16  ;;  %2036 = vmatpush1.bf16.msra.mxu0 %v2785_v12 }
  0xc1   :  { %2037 = vmatprep.subr.bf16.mxu0 %v2790_v41  ;;  %v2814_v41 = vld [vmem:[%s3790_s3 + $0x154] ss:$8 sps:$4 sm:$0xff]  }
  0xc2   :  { %1499 = vmatmul.mubr.bf16.vlgmr.msra.gmra.mrb[4].mxu1 %v3130_v15  ;;  %v2706_v15 = vld [vmem:[%s3788_s1 + $0x44c] ss:$16 sps:$4 sm:$0xff]  }
  0xc3   :  { %1510 = vmatpush1.bf16.msra.mxu1 %v2698_v18  ;;  %1541 = vmatprep.mubr.bf16.mxu1 %v3219_v44  ;;  %v2704_v44 = vld [vmem:[%s3788_s1 + $0x448] ss:$16 sps:$4 sm:$0xff]  }
  0xc4   :  { %1511 = vmatprep.subr.bf16.mxu1 %v2703_v19  ;;  %2038 = vmatpush1.bf16.msra.mxu0 %v2788_v42  ;;  %v2812_v42 = vld [vmem:[%s3790_s3 + $0x150] ss:$8 sps:$4 sm:$0xff]  }
  0xc5   :  { %2039 = vmatprep.subr.bf16.mxu0 %v2793_v46  ;;  %v2820_v46 = vld [vmem:[%s3790_s3 + $0x174] ss:$8 sps:$4 sm:$0xff]  }
  0xc7   :  { %1512 = vmatpush1.bf16.msra.mxu1 %v2701_v23 }
  0xc8   :  { %1513 = vmatprep.subr.bf16.mxu1 %v2706_v15  ;;  %2040 = vmatpush1.bf16.msra.mxu0 %v2791_v47  ;;  %v2818_v47 = vld [vmem:[%s3790_s3 + $0x170] ss:$8 sps:$4 sm:$0xff]  }
  0xc9   :  { %2041 = vmatprep.subr.bf16.mxu0 %v2796_v50  ;;  %v2826_v50 = vld [vmem:[%s3790_s3 + $0x194] ss:$8 sps:$4 sm:$0xff]  }
  0xcb   :  { %1514 = vmatpush1.bf16.msra.mxu1 %v2704_v44 }
  0xcc   :  { %1515 = vmatprep.subr.bf16.mxu1 %v2709_v27  ;;  %2042 = vmatpush1.bf16.msra.mxu0 %v2794_v51  ;;  %v2824_v51 = vld [vmem:[%s3790_s3 + $0x190] ss:$8 sps:$4 sm:$0xff]  }
  0xcd   :  { %2054 = vmatprep.subr.bf16.mxu0 %v2799_v54  ;;  %v2832_v54 = vld [vmem:[%s3790_s3 + $0x1b4] ss:$8 sps:$4 sm:$0xff]  }
  0xcf   :  { %1516 = vmatpush1.bf16.msra.mxu1 %v2707_v29 }
  0xd0   :  { %1517 = vmatprep.subr.bf16.mxu1 %v2712_v30 }
  0xd3   :  { %1518 = vmatpush1.bf16.msra.mxu1 %v2710_v31 }
  0xd4   :  { %1519 = vmatprep.subr.bf16.mxu1 %v2715_v55  ;;  %v2797_v55 = vld [vmem:[%s3790_s3 + $0x100] ss:$8 sps:$4 sm:$0xff]  }
  0xd7   :  { %1520 = vmatpush1.bf16.msra.mxu1 %v2713_v33  ;;  %v2802_v33 = vld [vmem:[%s3790_s3 + $0x114] ss:$8 sps:$4 sm:$0xff]  }
  0xd8   :  { %1521 = vmatprep.subr.bf16.mxu1 %v2718_v34  ;;  %v2800_v34 = vld [vmem:[%s3790_s3 + $0x110] ss:$8 sps:$4 sm:$0xff]  }
  0xdb   :  { %1522 = vmatpush1.bf16.msra.mxu1 %v2716_v35  ;;  %v2805_v35 = vld [vmem:[%s3790_s3 + $0x124] ss:$8 sps:$4 sm:$0xff]  }
  0xdc   :  { %1523 = vmatprep.subr.bf16.mxu1 %v2721_v36  ;;  %v2803_v36 = vld [vmem:[%s3790_s3 + $0x120] ss:$8 sps:$4 sm:$0xff]  }
  0xdf   :  { %1524 = vmatpush1.bf16.msra.mxu1 %v2719_v37  ;;  %v2808_v37 = vld [vmem:[%s3790_s3 + $0x134] ss:$8 sps:$4 sm:$0xff]  }
  0xe0   :  { %1525 = vmatprep.subr.bf16.mxu1 %v2724_v38  ;;  %v2806_v38 = vld [vmem:[%s3790_s3 + $0x130] ss:$8 sps:$4 sm:$0xff]  }
  0xe3   :  { %1526 = vmatpush1.bf16.msra.mxu1 %v2722_v39  ;;  %v2811_v39 = vld [vmem:[%s3790_s3 + $0x144] ss:$8 sps:$4 sm:$0xff]  }
  0xe4   :  { %1527 = vmatprep.subr.bf16.mxu1 %v2727_v40  ;;  %v2809_v40 = vld [vmem:[%s3790_s3 + $0x140] ss:$8 sps:$4 sm:$0xff]  }
  0xe7   :  { %1528 = vmatpush1.bf16.msra.mxu1 %v2725_v43  ;;  %v2817_v43 = vld [vmem:[%s3790_s3 + $0x164] ss:$8 sps:$4 sm:$0xff]  }
  0xe8   :  { %1529 = vmatprep.subr.bf16.mxu1 %v2730_v45  ;;  %v2815_v45 = vld [vmem:[%s3790_s3 + $0x160] ss:$8 sps:$4 sm:$0xff]  }
  0xeb   :  { %1530 = vmatpush1.bf16.msra.mxu1 %v2728_v48  ;;  %v2823_v48 = vld [vmem:[%s3790_s3 + $0x184] ss:$8 sps:$4 sm:$0xff]  }
  0xec   :  { %1531 = vmatprep.subr.bf16.mxu1 %v2733_v49  ;;  %v2821_v49 = vld [vmem:[%s3790_s3 + $0x180] ss:$8 sps:$4 sm:$0xff]  }
  0xef   :  { %1532 = vmatpush1.bf16.msra.mxu1 %v2731_v52  ;;  %v2829_v52 = vld [vmem:[%s3790_s3 + $0x1a4] ss:$8 sps:$4 sm:$0xff]  }
  0xf0   :  { %1533 = vmatprep.subr.bf16.mxu1 %v2736_v53  ;;  %v2827_v53 = vld [vmem:[%s3790_s3 + $0x1a0] ss:$8 sps:$4 sm:$0xff]  }
  0xf3   :  { %1534 = vmatpush1.bf16.msra.mxu1 %v2734_v56  ;;  %v2830_v56 = vld [vmem:[%s3790_s3 + $0x1b0] ss:$8 sps:$4 sm:$0xff]  }
  0xf4   :  { %1535 = vmatprep.subr.bf16.mxu1 %v2739_v57  ;;  %v2835_v57 = vld [vmem:[%s3790_s3 + $0x1c4] ss:$8 sps:$4 sm:$0xff]  }
  0xf7   :  { %1536 = vmatpush1.bf16.msra.mxu1 %v2737_v58  ;;  %v2833_v58 = vld [vmem:[%s3790_s3 + $0x1c0] ss:$8 sps:$4 sm:$0xff]  }
  0xf8   :  { %1537 = vmatprep.subr.bf16.mxu1 %v2742_v59  ;;  %v2838_v59 = vld [vmem:[%s3790_s3 + $0x1d4] ss:$8 sps:$4 sm:$0xff]  }
  0xfb   :  { %1538 = vmatpush1.bf16.msra.mxu1 %v2740_v60  ;;  %v2836_v60 = vld [vmem:[%s3790_s3 + $0x1d0] ss:$8 sps:$4 sm:$0xff]  }
  0xfc   :  { %1539 = vmatprep.subr.bf16.mxu1 %v2745_v61  ;;  %v2841_v61 = vld [vmem:[%s3790_s3 + $0x1e4] ss:$8 sps:$4 sm:$0xff]  }
  0xff   :  { %1540 = vmatpush1.bf16.msra.mxu1 %v2743_v62  ;;  %v2839_v62 = vld [vmem:[%s3790_s3 + $0x1e0] ss:$8 sps:$4 sm:$0xff]  }
 0x100   :  { %1552 = vmatprep.subr.bf16.mxu1 %v2748_v63  ;;  %v2844_v63 = vld [vmem:[%s3790_s3 + $0x1f4] ss:$8 sps:$4 sm:$0xff]  }
 0x102   :  { %1542 = vmatmul.mubr.bf16.vlgmr.msra.gmra.mrb[4].mxu1 %v3336_v22  ;;  %v3663_v22 = vld [vmem:[%s3791_s2] sm:$0xf] }
 0x103   :  { %1553 = vmatpush1.bf16.msra.mxu1 %v2746_v0  ;;  %1584 = vmatprep.mubr.bf16.mxu1 %v2853_v28  ;;  %v3666_v28 = vsub.s32 1, %v3655_v6  ;;  %v2842_v0 = vld [vmem:[%s3790_s3 + $0x1f0] ss:$8 sps:$4 sm:$0xff]  }
 0x105   :  { %v254_v8 = vrot.slane %v3663_v22, %v3666_v28 }
 0x10e   :  { %2347 = vmatmul.mubr.msk.bf16.vlgmr.msra.gmra.mrb[4].mxu1 %vm1247_vm0, %v3369_v32  ;;  %v250_v32 = vrot.slane %v3663_v22, %v3658_v7 }
 0x115   :  { %v1285_v1 = vpop.f32.mrb[0].mxu1 }
 0x116   :  { %v1287_v2 = vpop.f32.mrb[1].mxu1  ;;  %v1286_v9 = vadd.f32 %v1285_v1, %v250_v32  ;;  %v257_v1 = vsub.s32 2, %v3655_v6 }
 0x117   :  { %v1289_v3 = vpop.f32.mrb[2].mxu1  ;;  %v1288_v10 = vadd.f32 %v1287_v2, %v254_v8  ;;  %v261_v2 = vsub.s32 3, %v3655_v6 }
 0x118   :  { %v1291_v4 = vpop.f32.mrb[3].mxu1  ;;  %v1290_v13 = vadd.f32 %v1289_v3, %v250_v32  ;;  %v258_v3 = vrot.slane %v3663_v22, %v257_v1 }
 0x119   :  { %v1292_v17 = vadd.f32 %v1291_v4, %v254_v8  ;;  %v262_v4 = vrot.slane %v3663_v22, %v261_v2  ;;  %v1679_v22 = vld [vmem:[%s3792_s4] sm:$0x3] }
 0x162   :  { %v1414_v11 = vpop.f32.mrb[0].mxu0 }
 0x163   :  { %v2415_v14 = vadd.f32 %v1414_v11, %v1286_v9  ;;  %v1416_v16 = vpop.f32.mrb[1].mxu0 }
 0x164   :  { %v2417_v18 = vadd.f32 %v1416_v16, %v1288_v10  ;;  %v1418_v19 = vpop.f32.mrb[2].mxu0 }
 0x165   :  { %v1595_v20 = vmul.f32 0.2, %v2415_v14  ;;  %v2419_v21 = vadd.f32 %v1418_v19, %v1290_v13  ;;  %v1420_v23 = vpop.f32.mrb[3].mxu0 }
 0x166   :  { %v1596_v24 = vmul.f32 0.2, %v2417_v18  ;;  %v2421_v15 = vadd.f32 %v1420_v23, %v1292_v17 }
 0x167   :  { %v1599_v25 = vmul.f32 0.2, %v2419_v21  ;;  %v1603_v26 = vmax.f32 %v2415_v14, %v1595_v20 }
 0x168   :  { %v1600_v44 = vmul.f32 0.2, %v2421_v15  ;;  %v1604_v12 = vmax.f32 %v2417_v18, %v1596_v24 }
 0x169   :  { %v1607_v27 = vmax.f32 %v2419_v21, %v1599_v25  ;;  %v1684_v25 = vrot.slane %v1679_v22, %v3658_v7 }
 0x16a   :  { %v1608_v29 = vmax.f32 %v2421_v15, %v1600_v44  ;;  %v1688_v44 = vrot.slane %v1679_v22, %v3666_v28 }
 0x16b   :  { %v1611_v30 = vpack.c.bf16 %v1607_v27, %v1603_v26  ;;  %v2105_v27 = vld [vmem:[%s3793_s5] sm:$0x3] }
 0x16c   :  { %v1612_v31 = vpack.c.bf16 %v1608_v29, %v1604_v12 }
 0x16e   :  { %2043 = vmatprep.mubr.bf16.mxu0 %v1612_v31 }
 0x16f   :  { %2044 = vmatmul.mubr.bf16.vlgmr.msra.gmra.mrb[4].mxu0 %v1611_v30 }
 0x170   :  { %2055 = vmatpush1.bf16.msra.mxu0 %v2797_v55 }
 0x171   :  { %2056 = vmatprep.subr.bf16.mxu0 %v2802_v33 }
 0x174   :  { %2057 = vmatpush1.bf16.msra.mxu0 %v2800_v34 }
 0x175   :  { %2058 = vmatprep.subr.bf16.mxu0 %v2805_v35  ;;  %v2110_v35 = vrot.slane %v2105_v27, %v3658_v7  ;;  %v2128_v7 = vstv %s3794_s6 }
 0x178   :  { %2059 = vmatpush1.bf16.msra.mxu0 %v2803_v36 }
 0x179   :  { %2060 = vmatprep.subr.bf16.mxu0 %v2808_v37 }
 0x17c   :  { %2061 = vmatpush1.bf16.msra.mxu0 %v2806_v38  ;;  %v2114_v38 = vrot.slane %v2105_v27, %v3666_v28 }
 0x17d   :  { %2062 = vmatprep.subr.bf16.mxu0 %v2811_v39 }
 0x180   :  { %2063 = vmatpush1.bf16.msra.mxu0 %v2809_v40 }
 0x181   :  { %2064 = vmatprep.subr.bf16.mxu0 %v2814_v41 }
 0x184   :  { %2065 = vmatpush1.bf16.msra.mxu0 %v2812_v42 }
 0x185   :  { %2066 = vmatprep.subr.bf16.mxu0 %v2817_v43 }
 0x188   :  { %2067 = vmatpush1.bf16.msra.mxu0 %v2815_v45 }
 0x189   :  { %2068 = vmatprep.subr.bf16.mxu0 %v2820_v46 }
 0x18c   :  { %2069 = vmatpush1.bf16.msra.mxu0 %v2818_v47 }
 0x18d   :  { %2070 = vmatprep.subr.bf16.mxu0 %v2823_v48 }
 0x190   :  { %2071 = vmatpush1.bf16.msra.mxu0 %v2821_v49 }
 0x191   :  { %2072 = vmatprep.subr.bf16.mxu0 %v2826_v50 }
 0x194   :  { %2073 = vmatpush1.bf16.msra.mxu0 %v2824_v51 }
 0x195   :  { %2074 = vmatprep.subr.bf16.mxu0 %v2829_v52 }
 0x198   :  { %2075 = vmatpush1.bf16.msra.mxu0 %v2827_v53 }
 0x199   :  { %2076 = vmatprep.subr.bf16.mxu0 %v2832_v54 }
 0x19c   :  { %2077 = vmatpush1.bf16.msra.mxu0 %v2830_v56 }
 0x19d   :  { %2078 = vmatprep.subr.bf16.mxu0 %v2835_v57 }
 0x1a0   :  { %2079 = vmatpush1.bf16.msra.mxu0 %v2833_v58 }
 0x1a1   :  { %2080 = vmatprep.subr.bf16.mxu0 %v2838_v59 }
 0x1a4   :  { %2081 = vmatpush1.bf16.msra.mxu0 %v2836_v60 }
 0x1a5   :  { %2082 = vmatprep.subr.bf16.mxu0 %v2841_v61 }
 0x1a8   :  { %2083 = vmatpush1.bf16.msra.mxu0 %v2839_v62 }
 0x1a9   :  { %2084 = vmatprep.subr.bf16.mxu0 %v2844_v63 }
 0x1ac   :  { %2085 = vmatpush1.bf16.msra.mxu0 %v2842_v0 }
 0x1e1   :  { %v1586_v5 = vpop.f32.mrb[4].mxu1 }
 0x1e2   :  { %v2422_v32 = vadd.f32 %v1586_v5, %v258_v3  ;;  %v1588_v8 = vpop.f32.mrb[5].mxu1 }
 0x1e3   :  { %v2423_v9 = vadd.f32 %v1588_v8, %v262_v4  ;;  %v1590_v10 = vpop.f32.mrb[6].mxu1 }
 0x1e4   :  { %v1597_v11 = vmul.f32 0.2, %v2422_v32  ;;  %v2424_v13 = vadd.f32 %v1590_v10, %v258_v3  ;;  %v1592_v14 = vpop.f32.mrb[7].mxu1 }
 0x1e5   :  { %v1598_v16 = vmul.f32 0.2, %v2423_v9  ;;  %v2425_v17 = vadd.f32 %v1592_v14, %v262_v4 }
 0x1e6   :  { %v1601_v18 = vmul.f32 0.2, %v2424_v13  ;;  %v1605_v20 = vmax.f32 %v2422_v32, %v1597_v11 }
 0x1e7   :  { %v1602_v19 = vmul.f32 0.2, %v2425_v17  ;;  %v1606_v23 = vmax.f32 %v2423_v9, %v1598_v16 }
 0x1e8   :  { %v1609_v21 = vmax.f32 %v2424_v13, %v1601_v18 }
 0x1e9   :  { %v1610_v6 = vmax.f32 %v2425_v17, %v1602_v19 }
 0x1ea   :  { %v1613_v24 = vpack.c.bf16 %v1609_v21, %v1605_v20 }
 0x1eb   :  { %v1614_v15 = vpack.c.bf16 %v1610_v6, %v1606_v23 }
 0x1ed   :  { %2086 = vmatprep.mubr.bf16.mxu0 %v1614_v15 }
 0x1ee   :  { %2087 = vmatmul.mubr.bf16.vlgmr.msra.gmra.mrb[4].mxu0 %v1613_v24 }
 0x2c1   :  { %v2088_v26 = vpop.f32.mrb[4].mxu0 }
 0x2c2   :  { %v2426_v12 = vadd.f32 %v2088_v26, %v1684_v25  ;;  %v2090_v29 = vpop.f32.mrb[5].mxu0 }
 0x2c3   :  { %v2427_v30 = vadd.f32 %v2090_v29, %v1688_v44  ;;  %v2092_v31 = vpop.f32.mrb[6].mxu0 }
 0x2c4   :  { %v2097_v55 = vmul.f32 0.2, %v2426_v12  ;;  %v2428_v33 = vadd.f32 %v2092_v31, %v1684_v25  ;;  %v2094_v34 = vpop.f32.mrb[7].mxu0 }
 0x2c5   :  { %v2098_v36 = vmul.f32 0.2, %v2427_v30  ;;  %v2429_v37 = vadd.f32 %v2094_v34, %v1688_v44 }
 0x2c6   :  { %v2101_v39 = vmax.f32 %v2426_v12, %v2097_v55  ;;  %v2099_v40 = vmul.f32 0.2, %v2428_v33 }
 0x2c7   :  { %v2102_v41 = vmax.f32 %v2427_v30, %v2098_v36  ;;  %v2100_v42 = vmul.f32 0.2, %v2429_v37 }
 0x2c8   :  { %v2103_v43 = vmax.f32 %v2428_v33, %v2099_v40  ;;  %v2117_v45 = vmul.f32 %v2110_v35, %v2101_v39 }
 0x2c9   :  { %v2104_v46 = vmax.f32 %v2429_v37, %v2100_v42  ;;  %v2118_v47 = vmul.f32 %v2114_v38, %v2102_v41 }
 0x2ca   :  { %v2119_v48 = vmul.f32 %v2110_v35, %v2103_v43 }
 0x2cb   :  { %v2121_v49 = vadd.f32 %v2118_v47, %v2117_v45  ;;  %v2120_v50 = vmul.f32 %v2114_v38, %v2104_v46 }
 0x2cd   :  { %2122 = vadd.xlane.f32.xlu0 %v2121_v49  ;;  %v2124_v51 = vadd.f32 %v2120_v50, %v2119_v48 }
 0x2d1   :  { %2125 = vadd.xlane.f32.xlu0 %v2124_v51 }
 0x35a   :  { %v2123_v52 = vpop.xlane.xlu0 %2122 }
 0x35b   :  { %v2129_v28 = vadd.f32 %v2128_v7, %v2123_v52 }
 0x35d   :  { %v2412_v53 = vmul.f32 -1.442695, %v2129_v28 }
 0x35e   :  { %v2126_v54 = vpop.xlane.xlu0 %2125 }
 0x35f   :  { %2845 = vpow2.f32 %v2412_v53  ;;  %v2130_v56 = vadd.f32 %v2128_v7, %v2126_v54 }
 0x361   :  { %v2413_v57 = vmul.f32 -1.442695, %v2130_v56 }
 0x363   :  { %2847 = vpow2.f32 %v2413_v57 }
 0x369   :  { %v2846_v58 = vpop.eup %2845 }
 0x36a   :  { %v2137_v59 = vadd.f32 1.0, %v2846_v58 }
 0x36c   :  { %2849 = vrcp.f32 %v2137_v59 }
 0x36d   :  { %v2848_v60 = vpop.eup %2847 }
 0x36e   :  { %v2138_v61 = vadd.f32 1.0, %v2848_v60 }
 0x370   :  { %2851 = vrcp.f32 %v2138_v61 }
 0x376   :  { %v2850_v62 = vpop.eup %2849 }
 0x377   :  { %2144 = vst.msk [vmem:[%s3795_s7] sm:$0xff] %vm2143_vm1, %v2850_v62 }
 0x37a   :  { %v2852_v63 = vpop.eup %2851 }
 0x37b   :  { %2145 = vst.msk [vmem:[%s3795_s7 + $0x8] sm:$0xff] %vm2143_vm1, %v2852_v63 }

</bundles_post_ra>
